<compile_context>
chip_gen: v5e
topology: v5e:2x2
jax: 0.10.0
libtpu: 0.0.40
codegen_flags: <defaults>
</compile_context>

<pallas_src>
import jax
import jax.numpy as jnp
from jax import lax
from jax.experimental import pallas as pl
from jax.experimental.pallas import tpu as pltpu

NEG_SLOPE = 0.01  # torch.nn.LeakyReLU default


def _leaky(x):
    return jnp.where(x > 0, x, NEG_SLOPE * x)


def _round_up(n, m):
    return ((n + m - 1) // m) * m


def _make_kernel(*, K, dilation, p, p_pad, num_l, has_res, final, compute_dtype):
    needs_carry = (p > 0) and (num_l > 1)

    def kernel(*refs):
        if has_res:
            x_ref, w1c_ref, b1_ref, br_ref, w2_ref, b2_ref, o_ref = refs[:7]
            scratch = refs[7:]
        else:
            x_ref, w1c_ref, b1_ref, w2_ref, b2_ref, o_ref = refs[:6]
            br_ref = None
            scratch = refs[6:]

        Bt, Cin, Lt = x_ref.shape
        Cout = o_ref.shape[1]
        l_idx = pl.program_id(1)

        if needs_carry:
            cx_ref, ch_ref = scratch

            @pl.when(l_idx == 0)
            def _init():
                # causal left padding: sequence is preceded by zeros
                cx_ref[...] = jnp.zeros_like(cx_ref)
                ch_ref[...] = jnp.zeros_like(ch_ref)

        # Weights are pre-cast to compute_dtype in the wrapper; biases are f32.
        w1c = w1c_ref[...]                      # (M1, K*Cin)
        w2 = w2_ref[...]                        # (Cout, K*Cout)
        b1 = b1_ref[...]                        # (Cout, 1) f32
        b2 = b2_ref[...]
        br = br_ref[...] if has_res else None

        def slab_from(cur, prev):
            # cur: (C, Lt) in compute dtype; prev: (C, p_pad) carry or None.
            # Returns the K-tap slab (K*C, Lt); tap j = cur shifted right by
            # s = (K-1-j)*dilation, head lanes taken from prev (or zeros).
            if p == 0:
                return cur                                   # K == 1
            if prev is None:
                prev = jnp.zeros((cur.shape[0], p_pad), cur.dtype)
            win = jnp.concatenate([prev, cur], axis=1)       # (C, p_pad + Lt)
            taps = []
            for j in range(K):
                s = p - j * dilation
                taps.append(win[:, p_pad - s: p_pad - s + Lt])
            return jnp.concatenate(taps, axis=0)             # (K*C, Lt)

        for b in range(Bt):
            x_cd = x_ref[b].astype(compute_dtype)            # (Cin, Lt)

            # ---- conv1 (+ fused residual rows) ----
            prev_x = cx_ref[b] if needs_carry else None
            slab1 = slab_from(x_cd, prev_x)
            y1 = jnp.dot(w1c, slab1, preferred_element_type=jnp.float32)
            h1 = _leaky(y1[:Cout] + b1)                      # (Cout, Lt) f32
            if has_res:
                res = y1[Cout:] + br                         # residual rows
            else:
                res = x_ref[b].astype(jnp.float32)           # exact identity skip

            # ---- conv2 ----
            h1_cd = h1.astype(compute_dtype)
            prev_h = ch_ref[b] if needs_carry else None
            slab2 = slab_from(h1_cd, prev_h)
            y2 = jnp.dot(w2, slab2, preferred_element_type=jnp.float32)
            h2 = _leaky(y2 + b2)

            out = h2 + res
            if final:
                out = _leaky(out)
            o_ref[b] = out.astype(o_ref.dtype)

            if needs_carry:
                # carry only the last p_pad lanes (look-back window)
                @pl.when(l_idx < num_l - 1)
                def _carry(b=b, x_cd=x_cd, h1_cd=h1_cd):
                    cx_ref[b] = x_cd[:, Lt - p_pad:]
                    ch_ref[b] = h1_cd[:, Lt - p_pad:]

    return kernel


def _pack_conv_weight(w):
    # (Cout, Cin, K) torch layout -> (Cout, K*Cin), column index j*Cin + c
    Co, Ci, K = w.shape
    return jnp.transpose(w, (0, 2, 1)).reshape(Co, K * Ci)


def causal_conv_block(x, w1, b1, w2, b2, wres=None, bres=None, *,
                      kernel_size, dilation, final=False,
                      l_tile=None, b_tile=None, compute_dtype=jnp.float32):
    """CausalConvolutionBlock forward.

    x    : (B, Cin, L)                     PyTorch NCL layout
    w1   : (Cout, Cin, K),  b1: (Cout,)    first weight-normed causal conv
    w2   : (Cout, Cout, K), b2: (Cout,)    second weight-normed causal conv
    wres : (Cout, Cin, 1) or None, bres: (Cout,) or None  (None => identity)
    Returns (B, Cout, L).
    """
    B, Cin, L = x.shape
    Cout = w1.shape[0]
    K = int(kernel_size)
    d = int(dilation)
    p = (K - 1) * d                              # causal left padding / chomp
    p_pad = _round_up(p, 128) if p > 0 else 0

    has_res = wres is not None
    if not has_res:
        assert Cin == Cout, "identity residual needs Cin == Cout"

    # ---- channel padding to sublane multiples (8): always-fused MXU path ----
    Cin_p = _round_up(Cin, 8)
    Cout_p = _round_up(Cout, 8)
    x_p = jnp.pad(x, ((0, 0), (0, Cin_p - Cin), (0, 0))) if Cin_p != Cin else x

    def pad_w(w, co, ci):
        return jnp.pad(w, ((0, co - w.shape[0]), (0, ci - w.shape[1]), (0, 0)))

    w1_f = pad_w(w1, Cout_p, Cin_p)
    w2_f = pad_w(w2, Cout_p, Cout_p)
    b1_f = jnp.pad(b1, (0, Cout_p - Cout))
    b2_f = jnp.pad(b2, (0, Cout_p - Cout))

    w1_p = _pack_conv_weight(w1_f)               # (Cout_p, K*Cin_p)
    w2_p = _pack_conv_weight(w2_f)               # (Cout_p, K*Cout_p)

    if has_res:
        # fuse residual 1x1 into conv1's matmul: extra Cout_p rows acting only
        # on the s==0 (unshifted) tap's columns [(K-1)*Cin_p, K*Cin_p)
        wr = jnp.pad(wres[:, :, 0], ((0, Cout_p - Cout), (0, Cin_p - Cin)))
        wr_full = jnp.zeros((Cout_p, K * Cin_p), wr.dtype)
        wr_full = wr_full.at[:, (K - 1) * Cin_p:].set(wr)
        w1_c = jnp.concatenate([w1_p, wr_full], axis=0)      # (2*Cout_p, K*Cin_p)
        br_c = jnp.pad(bres, (0, Cout_p - Cout)).reshape(Cout_p, 1).astype(jnp.float32)
    else:
        w1_c = w1_p
        br_c = None

    w1_c = w1_c.astype(compute_dtype)            # pre-cast once in the wrapper
    w2_p = w2_p.astype(compute_dtype)
    b1_c = b1_f.reshape(Cout_p, 1).astype(jnp.float32)
    b2_c = b2_f.reshape(Cout_p, 1).astype(jnp.float32)

    # ---- hardware query (clamp VMEM to real capacity; v7x = 64 MiB) ---------
    try:
        vmem_cap = int(getattr(pltpu.get_tpu_info(), "vmem_capacity_bytes",
                               64 * 2**20))
    except Exception:
        vmem_cap = 64 * 2**20

    # ---- tile selection ------------------------------------------------------
    if b_tile is None:
        cands = [t for t in range(min(8, B), 0, -1) if B % t == 0]
        pref = [t for t in cands if B // t >= 2]   # keep >=2 programs on the
        b_tile = (pref or cands)[0]                # parallel axis (v7x: 2 TCs)
    assert B % b_tile == 0

    itemsize = jnp.dtype(x.dtype).itemsize
    cd_size = jnp.dtype(compute_dtype).itemsize

    def blk_bytes(t):
        io = b_tile * t * (Cin_p + Cout_p) * itemsize * 2        # double-buffered
        carry = (b_tile * p_pad * (Cin_p + Cout_p) * cd_size
                 if (p > 0 and t < L) else 0)
        return io + carry

    if l_tile is None:
        l_tile = L
        if L % 128 == 0:
            budget = int(0.4 * vmem_cap)
            for t in (2048, 1024, 512, 256, 128):
                if L % t == 0 and t >= p and blk_bytes(t) <= budget:
                    l_tile = t
                    break
    assert L % l_tile == 0
    assert l_tile == L or l_tile % 128 == 0, \
        "l_tile must be a multiple of 128 (lane width) or the full length"
    num_l = L // l_tile
    if num_l > 1:
        assert l_tile >= p, "time tile must cover the causal look-back (K-1)*d"
        assert p_pad <= l_tile

    needs_carry = (p > 0) and (num_l > 1)
    scratch = []
    if needs_carry:
        scratch = [pltpu.VMEM((b_tile, Cin_p, p_pad), compute_dtype),
                   pltpu.VMEM((b_tile, Cout_p, p_pad), compute_dtype)]

    vmem_limit = int(min(0.75 * vmem_cap,
                         max(32 * 2**20, 8 * blk_bytes(l_tile))))

    def _full(a):
        nd = a.ndim
        return pl.BlockSpec(a.shape, lambda b, l, nd=nd: (0,) * nd)

    x_spec = pl.BlockSpec((b_tile, Cin_p, l_tile), lambda b, l: (b, 0, l))
    o_spec = pl.BlockSpec((b_tile, Cout_p, l_tile), lambda b, l: (b, 0, l))

    if has_res:
        in_specs = [x_spec, _full(w1_c), _full(b1_c), _full(br_c),
                    _full(w2_p), _full(b2_c)]
        args = (x_p, w1_c, b1_c, br_c, w2_p, b2_c)
    else:
        in_specs = [x_spec, _full(w1_c), _full(b1_c), _full(w2_p), _full(b2_c)]
        args = (x_p, w1_c, b1_c, w2_p, b2_c)

    kernel = _make_kernel(K=K, dilation=d, p=p, p_pad=p_pad, num_l=num_l,
                          has_res=has_res, final=bool(final),
                          compute_dtype=compute_dtype)

    out = pl.pallas_call(
        kernel,
        out_shape=jax.ShapeDtypeStruct((B, Cout_p, L), x.dtype),
        grid_spec=pltpu.PrefetchScalarGridSpec(
            num_scalar_prefetch=0,
            # grid = (batch blocks, time blocks); time MUST stay innermost and
            # "arbitrary" — the VMEM carry relies on sequential time iteration.
            grid=(B // b_tile, num_l),
            in_specs=in_specs,
            out_specs=o_spec,
            scratch_shapes=scratch,
        ),
        compiler_params=pltpu.CompilerParams(
            dimension_semantics=("parallel", "arbitrary"),
            vmem_limit_bytes=vmem_limit),
    )(*args)

    if Cout_p != Cout:
        out = out[:, :Cout, :]
    return out


# ----------------------------- reference & test ------------------------------

def _weight_norm(v, g):
    # torch weight_norm default dim=0: per output-channel normalization
    norm = jnp.sqrt(jnp.sum(v * v, axis=(1, 2), keepdims=True))
    return g[:, None, None] * v / norm


def _reference(x, w1, b1, w2, b2, wres, bres, K, D, final):
    """Pure-JAX reference of the PyTorch forward (NCL layout)."""
    p = (K - 1) * D
    L = x.shape[2]

    def conv(inp, w, b):
        y = lax.conv_general_dilated(
            inp, w, window_strides=(1,), padding=[(p, p)],
            rhs_dilation=(D,), dimension_numbers=("NCH", "OIH", "NCH"))
        y = y + b[None, :, None]
        return y[:, :, :L]  # Chomp1d

    h = _leaky(conv(x, w1, b1))
    h = _leaky(conv(h, w2, b2))
    if wres is None:
        res = x
    else:
        res = jnp.einsum("bil,oi->bol", x, wres[:, :, 0]) + bres[None, :, None]
    out = h + res
    return _leaky(out) if final else out


def _make_params(key, Cin, Cout, K, with_res=True):
    ks = jax.random.split(key, 8)
    v1 = jax.random.normal(ks[0], (Cout, Cin, K), jnp.float32) * 0.3
    g1 = jax.random.uniform(ks[1], (Cout,), minval=0.5, maxval=1.5)
    b1 = jax.random.normal(ks[2], (Cout,), jnp.float32) * 0.1
    v2 = jax.random.normal(ks[3], (Cout, Cout, K), jnp.float32) * 0.3
    g2 = jax.random.uniform(ks[4], (Cout,), minval=0.5, maxval=1.5)
    b2 = jax.random.normal(ks[5], (Cout,), jnp.float32) * 0.1
    if with_res:
        wres = jax.random.normal(ks[6], (Cout, Cin, 1), jnp.float32) * 0.3
        bres = jax.random.normal(ks[7], (Cout,), jnp.float32) * 0.1
    else:
        wres, bres = None, None
    return _weight_norm(v1, g1), b1, _weight_norm(v2, g2), b2, wres, bres


if __name__ == "__main__":
    key = jax.random.PRNGKey(0)
    k1, k2, k3, kx1, kx2, kx3 = jax.random.split(key, 6)

    # Test 1: ragged channels (Cin=4 -> padded to 8), fused residual matmul,
    # single time tile, f32 compute, final LeakyReLU.
    B, Cin, Cout, L, K, D = 2, 4, 8, 128, 3, 2
    w1, b1, w2, b2, wres, bres = _make_params(k1, Cin, Cout, K)
    x = jax.random.normal(kx1, (B, Cin, L), jnp.float32)
    out = causal_conv_block(x, w1, b1, w2, b2, wres, bres,
                            kernel_size=K, dilation=D, final=True)
    out = jax.block_until_ready(out)
    ref = _reference(x, w1, b1, w2, b2, wres, bres, K, D, True)
    assert out.shape == (B, Cout, L)
    assert jnp.allclose(out, ref, rtol=1e-4, atol=1e-4), "test1 mismatch"

    # Test 2: multiple time tiles (small p_pad VMEM carry across tiles),
    # bf16 MXU compute with f32 accumulation, fused residual, no final ReLU.
    B, Cin, Cout, L, K, D = 2, 8, 16, 256, 3, 4
    w1, b1, w2, b2, wres, bres = _make_params(k2, Cin, Cout, K)
    x = jax.random.normal(kx2, (B, Cin, L), jnp.float32)
    out = causal_conv_block(x, w1, b1, w2, b2, wres, bres,
                            kernel_size=K, dilation=D, final=False,
                            l_tile=128, compute_dtype=jnp.bfloat16)
    out = jax.block_until_ready(out)
    ref = _reference(x, w1, b1, w2, b2, wres, bres, K, D, False)
    assert out.shape == (B, Cout, L)
    assert jnp.allclose(out, ref, rtol=3e-2, atol=3e-2), "test2 mismatch"

    # Test 3: identity residual (wres=None -> skip add, no matmul), multi-tile
    # carry, f32 compute.
    B, Cin, Cout, L, K, D = 2, 8, 8, 256, 3, 1
    w1, b1, w2, b2, wres, bres = _make_params(k3, Cin, Cout, K, with_res=False)
    x = jax.random.normal(kx3, (B, Cin, L), jnp.float32)
    out = causal_conv_block(x, w1, b1, w2, b2, None, None,
                            kernel_size=K, dilation=D, final=False, l_tile=128)
    out = jax.block_until_ready(out)
    ref = _reference(x, w1, b1, w2, b2, None, None, K, D, False)
    assert out.shape == (B, Cout, L)
    assert jnp.allclose(out, ref, rtol=1e-4, atol=1e-4), "test3 mismatch"

    print("KERNEL_OK")
</pallas_src>

<mosaic_0001>
module attributes {stable_mosaic.version = 11 : i64} {
  func.func @kernel(%arg0: i32, %arg1: i32, %arg2: memref<1x8x128xf32, #tpu.memory_space<vmem>>, %arg3: memref<16x24xf32, #tpu.memory_space<vmem>>, %arg4: memref<8x1xf32, #tpu.memory_space<vmem>>, %arg5: memref<8x1xf32, #tpu.memory_space<vmem>>, %arg6: memref<8x24xf32, #tpu.memory_space<vmem>>, %arg7: memref<8x1xf32, #tpu.memory_space<vmem>>, %arg8: memref<1x8x128xf32, #tpu.memory_space<vmem>>) attributes {dimension_semantics = [#tpu.dimension_semantics<parallel>, #tpu.dimension_semantics<arbitrary>], iteration_bounds = array<i64: 2, 1>, scalar_prefetch = 0 : i64, scratch_operands = 0 : i64, tpu.core_type = #tpu.core_type<tc>, window_params = [{transform_indices = @transform_0, window_bounds = array<i64: 1, 8, 128>}, {pipeline_mode = #tpu.pipeline_mode<synchronous>, transform_indices = @transform_1, window_bounds = array<i64: 16, 24>}, {pipeline_mode = #tpu.pipeline_mode<synchronous>, transform_indices = @transform_2, window_bounds = array<i64: 8, 1>}, {pipeline_mode = #tpu.pipeline_mode<synchronous>, transform_indices = @transform_3, window_bounds = array<i64: 8, 1>}, {pipeline_mode = #tpu.pipeline_mode<synchronous>, transform_indices = @transform_4, window_bounds = array<i64: 8, 24>}, {pipeline_mode = #tpu.pipeline_mode<synchronous>, transform_indices = @transform_5, window_bounds = array<i64: 8, 1>}, {transform_indices = @transform_6, window_bounds = array<i64: 1, 8, 128>}]} {
    %c0 = arith.constant 0 : index
    %c0_0 = arith.constant 0 : index
    %0 = vector.load %arg3[%c0, %c0_0] : memref<16x24xf32, #tpu.memory_space<vmem>>, vector<16x24xf32>
    %c0_1 = arith.constant 0 : index
    %c0_2 = arith.constant 0 : index
    %1 = vector.load %arg6[%c0_1, %c0_2] : memref<8x24xf32, #tpu.memory_space<vmem>>, vector<8x24xf32>
    %c0_3 = arith.constant 0 : index
    %c0_4 = arith.constant 0 : index
    %2 = vector.load %arg4[%c0_3, %c0_4] : memref<8x1xf32, #tpu.memory_space<vmem>>, vector<8x1xf32>
    %c0_5 = arith.constant 0 : index
    %c0_6 = arith.constant 0 : index
    %3 = vector.load %arg7[%c0_5, %c0_6] : memref<8x1xf32, #tpu.memory_space<vmem>>, vector<8x1xf32>
    %c0_7 = arith.constant 0 : index
    %c0_8 = arith.constant 0 : index
    %4 = vector.load %arg5[%c0_7, %c0_8] : memref<8x1xf32, #tpu.memory_space<vmem>>, vector<8x1xf32>
    %c0_9 = arith.constant 0 : index
    %c0_10 = arith.constant 0 : index
    %c0_11 = arith.constant 0 : index
    %5 = vector.load %arg2[%c0_9, %c0_10, %c0_11] : memref<1x8x128xf32, #tpu.memory_space<vmem>>, vector<1x8x128xf32>
    %6 = vector.shape_cast %5 : vector<1x8x128xf32> to vector<8x128xf32>
    %cst = arith.constant 0.000000e+00 : f32
    %7 = vector.broadcast %cst : f32 to vector<8x128xf32>
    %8 = tpu.concatenate %7, %6 in 1 : vector<8x128xf32>, vector<8x128xf32> -> vector<8x256xf32>
    %9 = vector.extract_strided_slice %8 {offsets = [0, 124], sizes = [8, 128], strides = [1, 1]} : vector<8x256xf32> to vector<8x128xf32>
    %10 = vector.extract_strided_slice %8 {offsets = [0, 126], sizes = [8, 128], strides = [1, 1]} : vector<8x256xf32> to vector<8x128xf32>
    %11 = vector.extract_strided_slice %8 {offsets = [0, 128], sizes = [8, 128], strides = [1, 1]} : vector<8x256xf32> to vector<8x128xf32>
    %12 = tpu.concatenate %9, %10, %11 in 0 : vector<8x128xf32>, vector<8x128xf32>, vector<8x128xf32> -> vector<24x128xf32>
    %cst_12 = arith.constant dense<0.000000e+00> : vector<16x128xf32>
    %13 = tpu.matmul %0, %12, %cst_12 {dimension_numbers = #tpu.dot_dimension_numbers<[1], [0], [0], [1], [0, 0, 1, 1], [], []>} : vector<16x24xf32>, vector<24x128xf32>, vector<16x128xf32> -> vector<16x128xf32>
    %14 = vector.extract_strided_slice %13 {offsets = [0, 0], sizes = [8, 128], strides = [1, 1]} : vector<16x128xf32> to vector<8x128xf32>
    %15 = vector.broadcast %2 : vector<8x1xf32> to vector<8x128xf32>
    %16 = arith.addf %14, %15 : vector<8x128xf32>
    %cst_13 = arith.constant 0.000000e+00 : f32
    %17 = vector.broadcast %cst_13 : f32 to vector<8x128xf32>
    %18 = arith.cmpf ogt, %16, %17 : vector<8x128xf32>
    %cst_14 = arith.constant 0.00999999977 : f32
    %19 = vector.broadcast %cst_14 : f32 to vector<8x128xf32>
    %20 = arith.mulf %19, %16 : vector<8x128xf32>
    %21 = arith.select %18, %16, %20 : vector<8x128xi1>, vector<8x128xf32>
    %22 = vector.extract_strided_slice %13 {offsets = [8, 0], sizes = [8, 128], strides = [1, 1]} : vector<16x128xf32> to vector<8x128xf32>
    %23 = vector.broadcast %4 : vector<8x1xf32> to vector<8x128xf32>
    %24 = arith.addf %22, %23 : vector<8x128xf32>
    %cst_15 = arith.constant 0.000000e+00 : f32
    %25 = vector.broadcast %cst_15 : f32 to vector<8x128xf32>
    %26 = tpu.concatenate %25, %21 in 1 : vector<8x128xf32>, vector<8x128xf32> -> vector<8x256xf32>
    %27 = vector.extract_strided_slice %26 {offsets = [0, 124], sizes = [8, 128], strides = [1, 1]} : vector<8x256xf32> to vector<8x128xf32>
    %28 = vector.extract_strided_slice %26 {offsets = [0, 126], sizes = [8, 128], strides = [1, 1]} : vector<8x256xf32> to vector<8x128xf32>
    %29 = vector.extract_strided_slice %26 {offsets = [0, 128], sizes = [8, 128], strides = [1, 1]} : vector<8x256xf32> to vector<8x128xf32>
    %30 = tpu.concatenate %27, %28, %29 in 0 : vector<8x128xf32>, vector<8x128xf32>, vector<8x128xf32> -> vector<24x128xf32>
    %cst_16 = arith.constant dense<0.000000e+00> : vector<8x128xf32>
    %31 = tpu.matmul %1, %30, %cst_16 {dimension_numbers = #tpu.dot_dimension_numbers<[1], [0], [0], [1], [0, 0, 1, 1], [], []>} : vector<8x24xf32>, vector<24x128xf32>, vector<8x128xf32> -> vector<8x128xf32>
    %32 = vector.broadcast %3 : vector<8x1xf32> to vector<8x128xf32>
    %33 = arith.addf %31, %32 : vector<8x128xf32>
    %cst_17 = arith.constant 0.000000e+00 : f32
    %34 = vector.broadcast %cst_17 : f32 to vector<8x128xf32>
    %35 = arith.cmpf ogt, %33, %34 : vector<8x128xf32>
    %cst_18 = arith.constant 0.00999999977 : f32
    %36 = vector.broadcast %cst_18 : f32 to vector<8x128xf32>
    %37 = arith.mulf %36, %33 : vector<8x128xf32>
    %38 = arith.select %35, %33, %37 : vector<8x128xi1>, vector<8x128xf32>
    %39 = arith.addf %38, %24 : vector<8x128xf32>
    %cst_19 = arith.constant 0.000000e+00 : f32
    %40 = vector.broadcast %cst_19 : f32 to vector<8x128xf32>
    %41 = arith.cmpf ogt, %39, %40 : vector<8x128xf32>
    %cst_20 = arith.constant 0.00999999977 : f32
    %42 = vector.broadcast %cst_20 : f32 to vector<8x128xf32>
    %43 = arith.mulf %42, %39 : vector<8x128xf32>
    %44 = arith.select %41, %39, %43 : vector<8x128xi1>, vector<8x128xf32>
    %c0_21 = arith.constant 0 : index
    %c0_22 = arith.constant 0 : index
    %c0_23 = arith.constant 0 : index
    %45 = vector.load %arg8[%c0_21, %c0_22, %c0_23] : memref<1x8x128xf32, #tpu.memory_space<vmem>>, vector<1x8x128xf32>
    %46 = vector.shape_cast %45 : vector<1x8x128xf32> to vector<8x128xf32>
    %47 = vector.shape_cast %44 : vector<8x128xf32> to vector<1x8x128xf32>
    tpu.vector_store %arg8[%c0_21, %c0_22, %c0_23], %47 {strides = array<i32>} : memref<1x8x128xf32, #tpu.memory_space<vmem>>, vector<1x8x128xf32>,
    return
  }
  func.func @transform_0(%arg0: i32, %arg1: i32) -> (i32, i32, i32) {
    %c0_i32 = arith.constant 0 : i32
    %c0_i32_0 = arith.constant 0 : i32
    return %arg0, %c0_i32, %arg1 : i32, i32, i32
  }
  func.func @transform_1(%arg0: i32, %arg1: i32) -> (i32, i32) {
    %c0_i32 = arith.constant 0 : i32
    %c0_i32_0 = arith.constant 0 : i32
    %c0_i32_1 = arith.constant 0 : i32
    return %c0_i32, %c0_i32_0 : i32, i32
  }
  func.func @transform_2(%arg0: i32, %arg1: i32) -> (i32, i32) {
    %c0_i32 = arith.constant 0 : i32
    %c0_i32_0 = arith.constant 0 : i32
    %c0_i32_1 = arith.constant 0 : i32
    return %c0_i32, %c0_i32_0 : i32, i32
  }
  func.func @transform_3(%arg0: i32, %arg1: i32) -> (i32, i32) {
    %c0_i32 = arith.constant 0 : i32
    %c0_i32_0 = arith.constant 0 : i32
    %c0_i32_1 = arith.constant 0 : i32
    return %c0_i32, %c0_i32_0 : i32, i32
  }
  func.func @transform_4(%arg0: i32, %arg1: i32) -> (i32, i32) {
    %c0_i32 = arith.constant 0 : i32
    %c0_i32_0 = arith.constant 0 : i32
    %c0_i32_1 = arith.constant 0 : i32
    return %c0_i32, %c0_i32_0 : i32, i32
  }
  func.func @transform_5(%arg0: i32, %arg1: i32) -> (i32, i32) {
    %c0_i32 = arith.constant 0 : i32
    %c0_i32_0 = arith.constant 0 : i32
    %c0_i32_1 = arith.constant 0 : i32
    return %c0_i32, %c0_i32_0 : i32, i32
  }
  func.func @transform_6(%arg0: i32, %arg1: i32) -> (i32, i32, i32) {
    %c0_i32 = arith.constant 0 : i32
    %c0_i32_0 = arith.constant 0 : i32
    return %arg0, %c0_i32, %arg1 : i32, i32, i32
  }
}

</mosaic_0001>

<bundles_post_ra>
// kernel: tpu_custom_call.1
= control target key start
LH: loop header
LB: loop body
LE: loop exit
PB: predicated region body
PF: predicated region fallthrough
CT: control target
= control target key end

     0   :  { %11 = vsyncpa [#allocation3], 0  ;;  %s929_s0 = inlined_call_operand.vmem [shape: f32[2,8,128], index: 0, kind: input, shape index: {}]   ;;  %s930_s1 = inlined_call_operand.hbm [shape: f32[16,24], index: 1, kind: input, shape index: {}]   ;;  %s931_s2 = inlined_call_operand.vmem [shape: f32[8,1], index: 2, kind: input, shape index: {}]   ;;  %s932_s3 = inlined_call_operand.vmem [shape: f32[8,1], index: 3, kind: input, shape index: {}]   ;;  %s933_s4 = inlined_call_operand.vmem [shape: f32[8,24], index: 4, kind: input, shape index: {}]   ;;  %s934_s5 = inlined_call_operand.vmem [shape: f32[8,1], index: 5, kind: input, shape index: {}]   ;;  %s935_s6 = inlined_call_operand.hbm [shape: f32[2,8,128], index: 6, kind: output, shape index: {}]  }
   0x1   :  { %12 = vsyncpa [#allocation4], 0 }
   0x2   :  { %14 = vsyncpa [#allocation4 + $0x1], 0  ;;  %s799_s21 = smov 0   ;;  %s801_s22 = smov 0  }
   0x3   :  { %s803_s23 = smov 0   ;;  %s805_s24 = smov 0  }
   0x4   :  { %s807_s25 = smov 0   ;;  %s809_s26 = smov 0  }
   0x5 LB: > { %s522_s27 = sadd.s32 4294967295, %s754_s26   ;;  %s523_s28 = sadd.s32 4294967294, %s754_s26   ;;  %s754_s26 = sphi %s809_s26, %s20_s26   ;;  %s750_s25 = sphi %s807_s25, %s942_s25   ;;  %s746_s24 = sphi %s805_s24, %s941_s24   ;;  %s742_s23 = sphi %s803_s23, %s940_s23   ;;  %s738_s22 = sphi %s801_s22, %s939_s22   ;;  %s734_s21 = sphi %s799_s21, %s938_s21  }
   0x6   : > { %s32_s29 = sadd.s32 1, %s750_s25  ;;  %s174_s30 = sadd.s32 1, %s742_s23 }
   0x7   : > { %p34_p0 = scmp.ge.s32.totalorder %s32_s29, 2  ;;  %p184_p1 = scmp.ne.s32.totalorder %s742_s23, %s738_s22 }
   0x8   : > { %p185_p2 = scmp.eq.s32.totalorder %s522_s27, 1  ;;  %p190_p3 = scmp.ne.s32.totalorder %s738_s22, %s734_s21 }
   0x9   : > { %s944_s29 = smov (%p34_p0, %s32_s29), 0  ;;  %p191_p5 = scmp.eq.s32.totalorder %s523_s28, 1 }
   0xa   : > { %p839_p4 = por %p185_p2, %p184_p1  ;;  %s169_s8 = ssub.s32 %s750_s25, %s944_s29 }
   0xb   : > { %p524_p6 = scmp.ge.s32.totalorder %s754_s26, 1  ;;  %p172_p7 = scmp.eq.s32.totalorder %s169_s8, 0 }
   0xc   : > { %p846_p8 = por %p191_p5, %p190_p3  ;;  %p198_p9 = scmp.lt.s32.totalorder %s754_s26, 3 }
   0xd   : > { %s852_s10 = scalar_select %p172_p7, %s742_s23, %s174_s30  }
   0xe   : > { %p199_p10 = pnand %p524_p6, %p198_p9  ;;  %p555_p11 = scmp.eq.s32.totalorder %s522_s27, 0 }
   0xf   : > { %s209_s13 = sshll.u32 %s930_s1, 4  ;;  %s756_s14 = smov [#allocation2]   ;;  %s210_s13 = int_to_ptr.hbm [resolvable:$true] %s209_s13 }
  0x10   : > { %p547_p12 = pneg %p199_p10  ;;  %s211_s15 = sshll.u32 %s756_s14, 4  ;;  %s212_s15 = int_to_ptr.vmem [resolvable:$true] %s211_s15 }
  0x11   : > { %s757_s16 = smov 128   ;;  %s758_s17 = smov 8  }
  0x12   : > { %p548_p13 = pnand %p555_p11, %p547_p12  ;;  %249 = sbr.rel (%p199_p10) target bundleno = 795 (0x31b), region = 44 }
  0x14   : > { %550 = dma.hbm_to_vmem [thread:$0]  (!%p548_p13), %s210_s13, 256, %s212_s15, [#allocation3], %s757_s16, %s757_s16, %s758_s17  }
  0x17   : > { %725 = dma.done.wait (%p555_p11), [#allocation3], 256  }
  0x18   : > { %727 = vsyncadd (%p555_p11), [#allocation3], 4294967040  ;;  %p282_p0 = scmp.lt.s32.totalorder %s746_s24, 1  ;;  %v759_v1 = vmov 0.0   ;;  %s760_s30 = smov 4   ;;  %vm302_vm0 = vcmask 1031168  }
  0x19   : > { %s761_s8 = smov 126   ;;  %s762_s11 = smov 124   ;;  %v292_v10 = vld [vmem:[%s931_s2] sm:$0xff]  ;;  %v763_v11 = vmov 0   ;;  %vm316_vm1 = vcmask 31744   ;;  %vm322_vm2 = vcmask 195584  }
  0x1a   : > { %s283_s18 = scalar_select %p282_p0, %s746_s24, 1  ;;  %629 = vset.pattern.permute.xlu2 %v763_v11  ;;  %640 = vset.pattern.permute.xlu1 %v763_v11  ;;  %v289_v20 = vld [vmem:[#allocation2] sm:$0xff]  ;;  %v290_v22 = vld [vmem:[#allocation2 + $0x8] sm:$0xff] }
  0x1b   : > { %641 = vset.pattern.permute.xlu0 %v763_v11  ;;  %v294_v33 = vld [vmem:[%s932_s3] sm:$0xff]  ;;  %s279_s20 = sand.u32 1, %s738_s22  }
  0x1c   : > { %s530_s19 = sshll.u32 %s283_s18, 3  ;;  %v293_v34 = vld [vmem:[%s934_s5] sm:$0xff]  ;;  %s529_s27 = sshll.u32 %s279_s20, 3 }
  0x1d   : > { %s288_s28 = scalar_lea.vmem %s929_s0, %s530_s19  ;;  %v291_v42 = vld [vmem:[%s933_s4] sm:$0xff]  ;;  %s281_s12 = scalar_lea.vmem [#allocation5], %s529_s27 }
  0x1e   : > { %v295_v0 = vld [vmem:[%s288_s28] sm:$0xff]  ;;  %s535_s28 = sshll.u32 %s746_s24, 3  ;;  %s436_s13 = sshll.u32 %s281_s12, 4  ;;  %s437_s13 = int_to_ptr.vmem [resolvable:$true] %s436_s13 }
  0x1f   : > { %v614_v2 = vpack.i.bf16 %v295_v0, %v759_v1  ;;  %308 = vrot.lane.b32.xlu2 %v295_v0, %s760_s30  ;;  %s423_s24 = scalar_lea.sflag [#allocation4], %s279_s20  ;;  %s692_s19 = scalar_lea.hbm %s935_s6, 16 }
  0x21   : > { %615 = vrot.lane.b32.xlu0 %v614_v2, %s761_s8 }
  0x27   : > { %354 = vperm.xlu2 %629, %v292_v10  }
  0x29   : > { %304 = vrot.lane.b32.xlu0 %v295_v0, %s762_s11 }
  0x79   : > { %v309_v18 = vpop.permute.xlu2 %308 }
  0x81   : > { %v355_v23 = vpop.permute.xlu2 %354 }
  0x93   : > { %v616_v3 = vpop.permute.xlu0 %615 }
  0x94   : > { %v618_v4 = vunpack.i.h.bf16 %v616_v3  ;;  %v617_v5 = vunpack.i.l.bf16 %v616_v3 }
  0x96   : > { %v303_v7 = vsel %vm302_vm0, %v617_v5, %v618_v4  ;;  %v624_v9 = vpack.i.bf16 0.0, %v618_v4 }
  0x9b   : > { %v305_v6 = vpop.permute.xlu0 %304 }
  0x9c   : > { %v619_v8 = vpack.i.bf16 %v303_v7, %v305_v6 }
  0x9e   : > { %620 = vrot.lane.b32.xlu1 %v619_v8, %s760_s30 }
  0xa6   : > { %625 = vrot.lane.b32.xlu1 %v624_v9, %s760_s30 }
 0x110   : > { %v621_v12 = vpop.permute.xlu1 %620 }
 0x111   : > { %v622_v13 = vunpack.i.l.bf16 %v621_v12  ;;  %v623_v15 = vunpack.i.h.bf16 %v621_v12 }
 0x113   : > { %342 = vmatpush.msra.mxu0 %v622_v13  ;;  %538 = vmatpush.msra.mxu2 %v622_v13 }
 0x118   : > { %v626_v14 = vpop.permute.xlu1 %625 }
 0x119   : > { %v628_v16 = vunpack.i.h.bf16 %v626_v14  ;;  %v627_v17 = vunpack.i.l.bf16 %v626_v14 }
 0x11b   : > { %v318_v19 = vsel %vm316_vm1, %v623_v15, %v627_v17  ;;  %v317_v21 = vsel %vm316_vm1, %v628_v16, %v309_v18 }
 0x11c   : > { %343 = vmatpush.msra.mxu0 %v318_v19  ;;  %539 = vmatpush.msra.mxu2 %v318_v19 }
 0x11e   : > { %344 = vmatpush.msra.mxu0 %v317_v21  ;;  %540 = vmatpush.msra.mxu2 %v317_v21 }
 0x11f   : > { %531 = vmatmul.msk.f32.vlgmr.msra.gmra.mxu0 %vm322_vm2, %v289_v20  ;;  %532 = vmatmul.msk.f32.vlgmr.msra.gmra.mxu2 %vm322_vm2, %v290_v22 }
 0x19c   : > { %v346_v24 = vpop.f32.mrf.mxu0 }
 0x19d   : > { %v357_v25 = vadd.f32 %v355_v23, %v346_v24 }
 0x19f   : > { %v359_v26 = vmul.f32 0.01, %v357_v25  ;;  %vm358_vm3 = vcmp.gt.f32.partialorder %v357_v25, 0.0 }
 0x1a1   : > { %v360_v27 = vsel %vm358_vm3, %v357_v25, %v359_v26 }
 0x1a2   : > { %371 = vrot.lane.b32.xlu1 %v360_v27, %s762_s11  ;;  %368 = vrot.lane.b32.xlu0 %v360_v27, %s761_s8  ;;  %v349_v46 = vpop.f32.mrf.mxu2  ;;  %s434_s11 = scalar_lea.hbm %s935_s6, %s535_s28 }
 0x1a3   : > { %s438_s14 = sshll.u32 %s434_s11, 4  ;;  %s439_s14 = int_to_ptr.hbm [resolvable:$true] %s438_s14 }
 0x1a4   : > { %s686_s15 = sshra.s32 %s439_s14, 4  ;;  %s687_s15 = int_to_ptr.hbm [resolvable:$true] %s686_s15 }
 0x1a5   : > { %s688_s16 = scalar_lea.hbm %s687_s15, 8  ;;  %p693_p5 = scmp.lt.s32.totalorder %s687_s15, %s935_s6 }
 0x1a6   : > { %p689_p1 = scmp.ne.s32.totalorder %s687_s15, %s688_s16  ;;  %p694_p6 = scmp.lt.s32.totalorder %s692_s19, %s688_s16 }
 0x1a8   : > { %p690_p2 = pnand %p689_p1, %p839_p4  ;;  %p695_p7 = por %p694_p6, %p693_p5 }
 0x1aa   : > { %375 = vperm.xlu1 %640, %v293_v34   ;;  %p691_p3 = pneg %p690_p2 }
 0x1ac   : > { %p696_p9 = pnand %p695_p7, %p691_p3 }
 0x214   : > { %v372_v28 = vpop.permute.xlu1 %371  ;;  %v369_v29 = vpop.permute.xlu0 %368 }
 0x215   : > { %v370_v30 = vsel %vm302_vm0, %v617_v5, %v369_v29  ;;  %v635_v31 = vpack.i.bf16 %v360_v27, %v369_v29 }
 0x216   : > { %v630_v32 = vpack.i.bf16 %v370_v30, %v372_v28 }
 0x217   : > { %636 = vrot.lane.b32.xlu0 %v635_v31, %s760_s30 }
 0x218   : > { %631 = vrot.lane.b32.xlu2 %v630_v32, %s760_s30 }
 0x21c   : > { %v376_v44 = vpop.permute.xlu1 %375 }
 0x220   : > { %363 = vperm.xlu2 %629, %v294_v33  }
 0x272   : > { %v632_v35 = vpop.permute.xlu2 %631 }
 0x273   : > { %v633_v36 = vunpack.i.l.bf16 %v632_v35  ;;  %v634_v38 = vunpack.i.h.bf16 %v632_v35 }
 0x275   : > { %407 = vmatpush.msra.mxu1 %v633_v36 }
 0x27a   : > { %v364_v47 = vpop.permute.xlu2 %363 }
 0x27b   : > { %v366_v50 = vadd.f32 %v364_v47, %v349_v46 }
 0x289   : > { %v637_v37 = vpop.permute.xlu0 %636 }
 0x28a   : > { %v639_v39 = vunpack.i.h.bf16 %v637_v37  ;;  %v638_v40 = vunpack.i.l.bf16 %v637_v37 }
 0x28c   : > { %v387_v41 = vsel %vm316_vm1, %v634_v38, %v638_v40  ;;  %v386_v43 = vsel %vm316_vm1, %v628_v16, %v639_v39 }
 0x28d   : > { %408 = vmatpush.msra.mxu1 %v387_v41 }
 0x28f   : > { %409 = vmatpush.msra.mxu1 %v386_v43 }
 0x290   : > { %533 = vmatmul.msk.f32.vlgmr.msra.gmra.mxu1 %vm322_vm2, %v291_v42 }
 0x30d   : > { %v411_v45 = vpop.f32.mrf.mxu1 }
 0x30e   : > { %v412_v48 = vadd.f32 %v411_v45, %v376_v44 }
 0x310   : > { %vm414_vm4 = vcmp.gt.f32.partialorder %v412_v48, 0.0  ;;  %v415_v49 = vmul.f32 0.01, %v412_v48 }
 0x312   : > { %v416_v51 = vsel %vm414_vm4, %v412_v48, %v415_v49 }
 0x313   : > { %v417_v52 = vadd.f32 %v416_v51, %v366_v50 }
 0x315   : > { %v419_v53 = vmul.f32 0.01, %v417_v52  ;;  %vm418_vm5 = vcmp.gt.f32.partialorder %v417_v52, 0.0 }
 0x317   : > { %v420_v54 = vsel %vm418_vm5, %v417_v52, %v419_v53 }
 0x318   : > { %421 = vst [vmem:[%s281_s12] sm:$0xff] %v420_v54 }
 0x319   : > { %699 = shalt.err (!%p696_p9)
}
 0x31a   : > { %545 = dma.vmem_to_hbm [thread:$0]  (%p839_p4), %s437_s13, 128, %s439_s14, %s423_s24  }
 0x31b PF: > { %p557_p10 = scmp.ge.s32.totalorder %s754_s26, 2  ;;  %s450_s20 = sand.u32 1, %s734_s21  }
 0x31c   : > { %s451_s30 = scalar_lea.sflag [#allocation4], %s450_s20 }
 0x31d   : > { %p552_p11 = pnand %p557_p10, %p846_p8 }
 0x31f   : > { %p553_p12 = pneg %p552_p11 }
 0x321   : > { %729 = dma.done.wait (%p553_p12), %s451_s30, 128  }
 0x322   : > { %731 = vsyncadd (%p553_p12), %s451_s30, 4294967168  ;;  %s20_s26 = sadd.s32 1, %s754_s26   ;;  %s938_s21 = smov %s738_s22 }
 0x323   : > { %p17_p13 = scmp.ge.s32.totalorder %s20_s26, 4   ;;  %s939_s22 = smov %s742_s23 }
 0x324   : > { %s940_s23 = smov %s852_s10  ;;  %s941_s24 = smov %s750_s25 }
 0x325   : > { %s942_s25 = smov %s944_s29  ;;  %19 = sbr.rel (!%p17_p13) target bundleno = 5 (0x5), region = 84 }
 0x32a   :  { %457 = vsyncpa [#allocation3], 1 }
 0x32b   :  { %459 = vsyncpa [#allocation3 + $0x1], 1 }
 0x32c   :  { %460 = vsyncpa [#allocation4], 1 }
 0x32d   :  { %462 = vsyncpa [#allocation4 + $0x1], 1 }

</bundles_post_ra>
